<compile_context>
chip_gen: v7x
topology: tpu7x:2x2x1
jax: 0.10.0
libtpu: 0.0.40
codegen_flags: <defaults>
</compile_context>

<pallas_src>
import functools

import jax
import jax.numpy as jnp
from jax.experimental import pallas as pl
from jax.experimental.pallas import tpu as pltpu


def _ffn_kernel(x_ref, w_up_ref, b_up_ref, w_out_ref, b_out_ref,
                gamma_ref, beta_ref, o_ref, acc_ref, *, eps):
    """One (token-tile, intermediate-tile) grid step.

    Grid = (M_pad // tm, I_pad // ti); axis 1 (innermost) is the reduction over
    the intermediate dim for the down-projection.  Each step runs one fused
    up/gate GEMM for a [tm, 2*ti] slice, applies SwiGLU, and accumulates its
    [tm, H] down-projection contribution into an f32 VMEM scratch.  The
    epilogue (output bias, residual, LayerNorm) runs once, on the last I step.
    """
    k = pl.program_id(1)

    @pl.when(k == 0)
    def _():
        acc_ref[...] = jnp.zeros_like(acc_ref)

    # x already arrives in the MXU dtype (cast once in the wrapper); no
    # per-step [tm, H] casts on the VPU.
    x_mxu = x_ref[...]

    # Fused up + gate projection: one [tm,H] x [H,2*ti] GEMM, f32 accumulation.
    hg = jnp.dot(x_mxu, w_up_ref[...], preferred_element_type=jnp.float32)
    hg = hg + b_up_ref[...]
    ti = hg.shape[-1] // 2
    h = hg[:, :ti]
    g = hg[:, ti:]

    # SwiGLU in f32 (sigmoid -> EUP, muls -> VPU).
    act = (h * jax.nn.sigmoid(h)) * g

    # Down-projection: accumulate this slice's contribution in f32.
    acc_ref[...] += jnp.dot(act.astype(w_out_ref.dtype), w_out_ref[...],
                            preferred_element_type=jnp.float32)

    @pl.when(k == pl.num_programs(1) - 1)
    def _():
        # Output bias + residual + LayerNorm over the hidden (lane) axis.
        # Residual is read exactly once, here, and promoted to f32.
        y = acc_ref[...] + b_out_ref[...] + x_ref[...].astype(jnp.float32)
        mean = jnp.mean(y, axis=-1, keepdims=True)
        centered = y - mean
        var = jnp.mean(centered * centered, axis=-1, keepdims=True)
        y_norm = centered * jax.lax.rsqrt(var + eps)
        o_ref[...] = (y_norm * gamma_ref[...] + beta_ref[...]).astype(o_ref.dtype)


def _round_up(n, m):
    return ((n + m - 1) // m) * m


def subspace_feed_forward(x, params, *, eps=1e-12, block_m=512, block_i=None,
                          mxu_dtype=jnp.bfloat16):
    """x: [B, S, H]. params: dict of weights (see init_params).

    block_m: target token-tile rows (padded/clamped to a multiple of 8).
    block_i: target intermediate-dim tile (multiple of 128); default is picked
             from the chip's VMEM capacity (256 on <=64 MiB, else 512).
    mxu_dtype: dtype of the GEMM operands and of x inside the kernel
               (None => keep the original dtypes; exact f32 path).
    """
    B, S, H = x.shape
    M = B * S
    I = params["w_in"].shape[1]

    # Generation-aware VMEM budget (v5e/v6e: 128 MiB, v7x: 64 MiB per TC).
    mib = 1024 * 1024
    try:
        vmem_cap = int(pltpu.get_tpu_info().vmem_capacity_bytes)
    except Exception:  # conservative fallback if the query is unavailable
        vmem_cap = 64 * mib
    vmem_limit = int(min(max(vmem_cap - 8 * mib, 32 * mib), 110 * mib))

    if block_i is None:
        block_i = 256 if vmem_cap <= 64 * mib else 512

    # Token tiling: pad M up instead of shrinking to awkward divisors.
    if M <= block_m:
        tm = _round_up(M, 8)
        m_pad = tm
    else:
        tm = _round_up(block_m, 8)
        m_pad = _round_up(M, tm)

    # Intermediate tiling: full dim if it fits, else 128-aligned tiles + pad.
    if I <= block_i:
        ti = I
        i_pad = I
    else:
        ti = _round_up(block_i, 128)
        i_pad = _round_up(I, ti)
    kt = i_pad // ti

    w_dtype = params["w_in"].dtype if mxu_dtype is None else mxu_dtype
    x_kdtype = x.dtype if mxu_dtype is None else mxu_dtype

    # x cast to the MXU dtype once (halves DMA bytes / VMEM footprint vs f32).
    x2d = x.reshape(M, H).astype(x_kdtype)
    if m_pad != M:
        x2d = jnp.pad(x2d, ((0, m_pad - M), (0, 0)))

    def pad_cols(a):
        return a if i_pad == I else jnp.pad(a, ((0, 0), (0, i_pad - I)))

    def pad_rows(a):
        return a if i_pad == I else jnp.pad(a, ((0, i_pad - I), (0, 0)))

    w_in = pad_cols(params["w_in"]).astype(w_dtype)
    w_gate = pad_cols(params["w_gate"]).astype(w_dtype)
    b_in = pad_cols(params["b_in"]).astype(jnp.float32)
    b_gate = pad_cols(params["b_gate"]).astype(jnp.float32)
    w_out = pad_rows(params["w_out"]).astype(w_dtype)
    b_out = params["b_out"].astype(jnp.float32)
    gamma = params["gamma"].astype(jnp.float32)
    beta = params["beta"].astype(jnp.float32)

    # Fuse W_in / W_gate (and biases) so each k-step is a single GEMM.
    # Column layout for tile k: [ W_in[:, k*ti:(k+1)*ti] | W_gate[:, k*ti:(k+1)*ti] ].
    w_up = jnp.concatenate(
        [w_in.reshape(H, kt, 1, ti), w_gate.reshape(H, kt, 1, ti)], axis=2
    ).reshape(H, kt * 2 * ti)
    b_up = jnp.concatenate(
        [b_in.reshape(1, kt, 1, ti), b_gate.reshape(1, kt, 1, ti)], axis=2
    ).reshape(1, kt * 2 * ti)

    kernel = functools.partial(_ffn_kernel, eps=eps)

    w_bytes = jnp.dtype(w_dtype).itemsize
    xk_bytes = jnp.dtype(x_kdtype).itemsize
    grid_m = m_pad // tm
    cost = pl.CostEstimate(
        flops=6 * m_pad * H * i_pad,            # three [M,H]x[H,I]-sized GEMMs
        transcendentals=m_pad * i_pad + m_pad,  # sigmoid + rsqrt
        bytes_accessed=(grid_m * 3 * H * i_pad * w_bytes      # weights per token tile
                        + m_pad * H * xk_bytes                # x in
                        + m_pad * H * jnp.dtype(x.dtype).itemsize  # out
                        + (2 * i_pad + 3 * H) * 4),           # bias / LN vectors
    )

    out2d = pl.pallas_call(
        kernel,
        out_shape=jax.ShapeDtypeStruct((m_pad, H), x.dtype),
        grid_spec=pltpu.PrefetchScalarGridSpec(
            num_scalar_prefetch=0,
            grid=(grid_m, kt),
            in_specs=[
                # x tile: index constant in k -> not re-DMA'd across the I loop.
                pl.BlockSpec((tm, H), lambda i, k: (i, 0)),
                pl.BlockSpec((H, 2 * ti), lambda i, k: (0, k)),   # fused W_in|W_gate
                pl.BlockSpec((1, 2 * ti), lambda i, k: (0, k)),   # fused b_in|b_gate
                pl.BlockSpec((ti, H), lambda i, k: (k, 0)),       # W_out slice
                pl.BlockSpec((1, H), lambda i, k: (0, 0)),        # b_out
                pl.BlockSpec((1, H), lambda i, k: (0, 0)),        # gamma
                pl.BlockSpec((1, H), lambda i, k: (0, 0)),        # beta
            ],
            out_specs=pl.BlockSpec((tm, H), lambda i, k: (i, 0)),
            scratch_shapes=[pltpu.VMEM((tm, H), jnp.float32)],
        ),
        compiler_params=pltpu.CompilerParams(
            # Token axis parallel (megacore on v7x); I axis is a reduction.
            dimension_semantics=("parallel", "arbitrary"),
            vmem_limit_bytes=vmem_limit,
        ),
        cost_estimate=cost,
    )(x2d, w_up, b_up, w_out, b_out, gamma, beta)

    if m_pad != M:
        out2d = out2d[:M]
    return out2d.reshape(B, S, H)


def init_params(key, hidden_dim, intermediate_dim):
    """Deterministic synthetic parameters (dense / non-decomposed variant)."""
    ks = jax.random.split(key, 6)
    scale_h = 1.0 / jnp.sqrt(hidden_dim)
    scale_i = 1.0 / jnp.sqrt(intermediate_dim)
    return {
        "w_in":   jax.random.normal(ks[0], (hidden_dim, intermediate_dim),
                                    jnp.float32) * scale_h,
        "b_in":   jax.random.normal(ks[1], (1, intermediate_dim),
                                    jnp.float32) * 0.01,
        "w_gate": jax.random.normal(ks[2], (hidden_dim, intermediate_dim),
                                    jnp.float32) * scale_h,
        "b_gate": jax.random.normal(ks[3], (1, intermediate_dim),
                                    jnp.float32) * 0.01,
        "w_out":  jax.random.normal(ks[4], (intermediate_dim, hidden_dim),
                                    jnp.float32) * scale_i,
        "b_out":  jax.random.normal(ks[5], (1, hidden_dim),
                                    jnp.float32) * 0.01,
        "gamma":  jnp.ones((1, hidden_dim), jnp.float32),
        "beta":   jnp.zeros((1, hidden_dim), jnp.float32),
    }


def _reference(x, params, eps):
    # Pure-JAX reference for a sanity check.
    B, S, H = x.shape
    x2d = x.reshape(B * S, H)
    h = x2d @ params["w_in"] + params["b_in"]
    g = x2d @ params["w_gate"] + params["b_gate"]
    a = jax.nn.silu(h) * g
    y = a @ params["w_out"] + params["b_out"] + x2d
    mean = y.mean(-1, keepdims=True)
    var = ((y - mean) ** 2).mean(-1, keepdims=True)
    out = (y - mean) / jnp.sqrt(var + eps) * params["gamma"] + params["beta"]
    return out.reshape(B, S, H)


def _check(x, params, eps, **kw):
    ref = _reference(x, params, eps)

    # f32 MXU path: tight check against the pure-JAX reference.
    out_f32 = jax.block_until_ready(
        subspace_feed_forward(x, params, eps=eps, mxu_dtype=None, **kw))
    assert out_f32.shape == x.shape
    assert jnp.allclose(out_f32, ref, atol=1e-4, rtol=1e-4), "f32 mismatch vs reference"

    # bf16 MXU path (default perf config): looser tolerance (bf16 GEMM + residual).
    out_bf16 = jax.block_until_ready(
        subspace_feed_forward(x, params, eps=eps, **kw))
    assert out_bf16.shape == x.shape
    assert jnp.allclose(out_bf16, ref, atol=5e-2, rtol=5e-2), "bf16 mismatch vs reference"


if __name__ == "__main__":
    eps = 1e-12
    key = jax.random.PRNGKey(0)

    # Case 1: tidy small shapes, single-tile grid.
    k_x, k_p, key = jax.random.split(key, 3)
    B, S, H, I = 2, 8, 32, 64
    x = jax.random.normal(k_x, (B, S, H), jnp.float32)
    params = init_params(k_p, H, I)
    _check(x, params, eps)

    # Case 2: awkward token count (padding path) + multi-step I reduction.
    k_x2, k_p2, key = jax.random.split(key, 3)
    B2, S2, H2, I2 = 1, 5, 32, 256
    x2 = jax.random.normal(k_x2, (B2, S2, H2), jnp.float32)
    params2 = init_params(k_p2, H2, I2)
    _check(x2, params2, eps, block_i=128)   # -> ti=128, two reduction steps

    print("KERNEL_OK")
</pallas_src>

<mosaic_0001>
module attributes {stable_mosaic.version = 11 : i64} {
  func.func @_ffn_kernel(%arg0: i32, %arg1: i32, %arg2: memref<16x32xf32, #tpu.memory_space<vmem>>, %arg3: memref<32x128xf32, #tpu.memory_space<vmem>>, %arg4: memref<1x128xf32, #tpu.memory_space<vmem>>, %arg5: memref<64x32xf32, #tpu.memory_space<vmem>>, %arg6: memref<1x32xf32, #tpu.memory_space<vmem>>, %arg7: memref<1x32xf32, #tpu.memory_space<vmem>>, %arg8: memref<1x32xf32, #tpu.memory_space<vmem>>, %arg9: memref<16x32xf32, #tpu.memory_space<vmem>>, %arg10: memref<16x32xf32, #tpu.memory_space<vmem>>) attributes {dimension_semantics = [#tpu.dimension_semantics<parallel>, #tpu.dimension_semantics<arbitrary>], iteration_bounds = array<i64: 1, 1>, scalar_prefetch = 0 : i64, scratch_operands = 1 : i64, tpu.core_type = #tpu.core_type<tc>, window_params = [{transform_indices = @transform_0, window_bounds = array<i64: 16, 32>}, {transform_indices = @transform_1, window_bounds = array<i64: 32, 128>}, {transform_indices = @transform_2, window_bounds = array<i64: 1, 128>}, {transform_indices = @transform_3, window_bounds = array<i64: 64, 32>}, {pipeline_mode = #tpu.pipeline_mode<synchronous>, transform_indices = @transform_4, window_bounds = array<i64: 1, 32>}, {pipeline_mode = #tpu.pipeline_mode<synchronous>, transform_indices = @transform_5, window_bounds = array<i64: 1, 32>}, {pipeline_mode = #tpu.pipeline_mode<synchronous>, transform_indices = @transform_6, window_bounds = array<i64: 1, 32>}, {transform_indices = @transform_7, window_bounds = array<i64: 16, 32>}]} {
    %c0_i32 = arith.constant 0 : i32
    %0 = arith.cmpi eq, %arg1, %c0_i32 : i32
    %1 = arith.extui %0 : i1 to i32
    %c0_i32_0 = arith.constant 0 : i32
    %2 = arith.cmpi ne, %1, %c0_i32_0 : i32
    scf.if %2 {
      %cst_16 = arith.constant 0.000000e+00 : f32
      %26 = vector.broadcast %cst_16 : f32 to vector<16x32xf32>
      %c0_17 = arith.constant 0 : index
      %c0_18 = arith.constant 0 : index
      %27 = vector.load %arg10[%c0_17, %c0_18] : memref<16x32xf32, #tpu.memory_space<vmem>>, vector<16x32xf32>
      tpu.vector_store %arg10[%c0_17, %c0_18], %26 {strides = array<i32>} : memref<16x32xf32, #tpu.memory_space<vmem>>, vector<16x32xf32>,
    } else {
    }
    %c0 = arith.constant 0 : index
    %c0_1 = arith.constant 0 : index
    %3 = vector.load %arg2[%c0, %c0_1] : memref<16x32xf32, #tpu.memory_space<vmem>>, vector<16x32xf32>
    %c0_2 = arith.constant 0 : index
    %c0_3 = arith.constant 0 : index
    %4 = vector.load %arg3[%c0_2, %c0_3] : memref<32x128xf32, #tpu.memory_space<vmem>>, vector<32x128xf32>
    %cst = arith.constant dense<0.000000e+00> : vector<16x128xf32>
    %5 = tpu.matmul %3, %4, %cst {dimension_numbers = #tpu.dot_dimension_numbers<[1], [0], [0], [1], [0, 0, 1, 1], [], []>} : vector<16x32xf32>, vector<32x128xf32>, vector<16x128xf32> -> vector<16x128xf32>
    %c0_4 = arith.constant 0 : index
    %c0_5 = arith.constant 0 : index
    %6 = vector.load %arg4[%c0_4, %c0_5] : memref<1x128xf32, #tpu.memory_space<vmem>>, vector<1x128xf32>
    %7 = vector.broadcast %6 : vector<1x128xf32> to vector<16x128xf32>
    %8 = arith.addf %5, %7 : vector<16x128xf32>
    %9 = vector.extract_strided_slice %8 {offsets = [0, 0], sizes = [16, 64], strides = [1, 1]} : vector<16x128xf32> to vector<16x64xf32>
    %10 = vector.extract_strided_slice %8 {offsets = [0, 64], sizes = [16, 64], strides = [1, 1]} : vector<16x128xf32> to vector<16x64xf32>
    %11 = arith.negf %9 : vector<16x64xf32>
    %12 = math.exp %11 : vector<16x64xf32>
    %cst_6 = arith.constant 1.000000e+00 : f32
    %13 = vector.broadcast %cst_6 : f32 to vector<16x64xf32>
    %14 = arith.addf %13, %12 : vector<16x64xf32>
    %15 = arith.divf %13, %14 : vector<16x64xf32>
    %16 = arith.mulf %9, %15 : vector<16x64xf32>
    %17 = arith.mulf %16, %10 : vector<16x64xf32>
    %c0_7 = arith.constant 0 : index
    %c0_8 = arith.constant 0 : index
    %18 = vector.load %arg10[%c0_7, %c0_8] : memref<16x32xf32, #tpu.memory_space<vmem>>, vector<16x32xf32>
    %c0_9 = arith.constant 0 : index
    %c0_10 = arith.constant 0 : index
    %19 = vector.load %arg5[%c0_9, %c0_10] : memref<64x32xf32, #tpu.memory_space<vmem>>, vector<64x32xf32>
    %cst_11 = arith.constant dense<0.000000e+00> : vector<16x32xf32>
    %20 = tpu.matmul %17, %19, %cst_11 {dimension_numbers = #tpu.dot_dimension_numbers<[1], [0], [0], [1], [0, 0, 1, 1], [], []>} : vector<16x64xf32>, vector<64x32xf32>, vector<16x32xf32> -> vector<16x32xf32>
    %21 = arith.addf %18, %20 : vector<16x32xf32>
    %c0_12 = arith.constant 0 : index
    %c0_13 = arith.constant 0 : index
    %22 = vector.load %arg10[%c0_12, %c0_13] : memref<16x32xf32, #tpu.memory_space<vmem>>, vector<16x32xf32>
    tpu.vector_store %arg10[%c0_12, %c0_13], %21 {strides = array<i32>} : memref<16x32xf32, #tpu.memory_space<vmem>>, vector<16x32xf32>,
    %c0_i32_14 = arith.constant 0 : i32
    %23 = arith.cmpi eq, %arg1, %c0_i32_14 : i32
    %24 = arith.extui %23 : i1 to i32
    %c0_i32_15 = arith.constant 0 : i32
    %25 = arith.cmpi ne, %24, %c0_i32_15 : i32
    scf.if %25 {
      %c0_16 = arith.constant 0 : index
      %c0_17 = arith.constant 0 : index
      %26 = vector.load %arg10[%c0_16, %c0_17] : memref<16x32xf32, #tpu.memory_space<vmem>>, vector<16x32xf32>
      %c0_18 = arith.constant 0 : index
      %c0_19 = arith.constant 0 : index
      %27 = vector.load %arg6[%c0_18, %c0_19] : memref<1x32xf32, #tpu.memory_space<vmem>>, vector<1x32xf32>
      %28 = vector.broadcast %27 : vector<1x32xf32> to vector<16x32xf32>
      %29 = arith.addf %26, %28 : vector<16x32xf32>
      %c0_20 = arith.constant 0 : index
      %c0_21 = arith.constant 0 : index
      %30 = vector.load %arg2[%c0_20, %c0_21] : memref<16x32xf32, #tpu.memory_space<vmem>>, vector<16x32xf32>
      %31 = arith.addf %29, %30 : vector<16x32xf32>
      %cst_22 = arith.constant dense<0.000000e+00> : vector<16xf32>
      %32 = vector.multi_reduction <add>, %31, %cst_22 [1] : vector<16x32xf32> to vector<16xf32>
      %33 = vector.shape_cast %32 : vector<16xf32> to vector<16x1xf32>
      %cst_23 = arith.constant 3.200000e+01 : f32
      %34 = vector.broadcast %cst_23 : f32 to vector<16x1xf32>
      %35 = arith.divf %33, %34 : vector<16x1xf32>
      %36 = vector.broadcast %35 : vector<16x1xf32> to vector<16x32xf32>
      %37 = arith.subf %31, %36 : vector<16x32xf32>
      %38 = arith.mulf %37, %37 : vector<16x32xf32>
      %cst_24 = arith.constant dense<0.000000e+00> : vector<16xf32>
      %39 = vector.multi_reduction <add>, %38, %cst_24 [1] : vector<16x32xf32> to vector<16xf32>
      %40 = vector.shape_cast %39 : vector<16xf32> to vector<16x1xf32>
      %cst_25 = arith.constant 3.200000e+01 : f32
      %41 = vector.broadcast %cst_25 : f32 to vector<16x1xf32>
      %42 = arith.divf %40, %41 : vector<16x1xf32>
      %cst_26 = arith.constant 9.99999996E-13 : f32
      %43 = vector.broadcast %cst_26 : f32 to vector<16x1xf32>
      %44 = arith.addf %42, %43 : vector<16x1xf32>
      %45 = math.rsqrt %44 : vector<16x1xf32>
      %46 = vector.broadcast %45 : vector<16x1xf32> to vector<16x32xf32>
      %47 = arith.mulf %37, %46 : vector<16x32xf32>
      %c0_27 = arith.constant 0 : index
      %c0_28 = arith.constant 0 : index
      %48 = vector.load %arg7[%c0_27, %c0_28] : memref<1x32xf32, #tpu.memory_space<vmem>>, vector<1x32xf32>
      %49 = vector.broadcast %48 : vector<1x32xf32> to vector<16x32xf32>
      %50 = arith.mulf %47, %49 : vector<16x32xf32>
      %c0_29 = arith.constant 0 : index
      %c0_30 = arith.constant 0 : index
      %51 = vector.load %arg8[%c0_29, %c0_30] : memref<1x32xf32, #tpu.memory_space<vmem>>, vector<1x32xf32>
      %52 = vector.broadcast %51 : vector<1x32xf32> to vector<16x32xf32>
      %53 = arith.addf %50, %52 : vector<16x32xf32>
      %c0_31 = arith.constant 0 : index
      %c0_32 = arith.constant 0 : index
      %54 = vector.load %arg9[%c0_31, %c0_32] : memref<16x32xf32, #tpu.memory_space<vmem>>, vector<16x32xf32>
      tpu.vector_store %arg9[%c0_31, %c0_32], %53 {strides = array<i32>} : memref<16x32xf32, #tpu.memory_space<vmem>>, vector<16x32xf32>,
    } else {
    }
    return
  }
  func.func @transform_0(%arg0: i32, %arg1: i32) -> (i32, i32) {
    %c0_i32 = arith.constant 0 : i32
    %c0_i32_0 = arith.constant 0 : i32
    return %arg0, %c0_i32 : i32, i32
  }
  func.func @transform_1(%arg0: i32, %arg1: i32) -> (i32, i32) {
    %c0_i32 = arith.constant 0 : i32
    %c0_i32_0 = arith.constant 0 : i32
    return %c0_i32, %arg1 : i32, i32
  }
  func.func @transform_2(%arg0: i32, %arg1: i32) -> (i32, i32) {
    %c0_i32 = arith.constant 0 : i32
    %c0_i32_0 = arith.constant 0 : i32
    return %c0_i32, %arg1 : i32, i32
  }
  func.func @transform_3(%arg0: i32, %arg1: i32) -> (i32, i32) {
    %c0_i32 = arith.constant 0 : i32
    %c0_i32_0 = arith.constant 0 : i32
    return %arg1, %c0_i32 : i32, i32
  }
  func.func @transform_4(%arg0: i32, %arg1: i32) -> (i32, i32) {
    %c0_i32 = arith.constant 0 : i32
    %c0_i32_0 = arith.constant 0 : i32
    %c0_i32_1 = arith.constant 0 : i32
    return %c0_i32, %c0_i32_0 : i32, i32
  }
  func.func @transform_5(%arg0: i32, %arg1: i32) -> (i32, i32) {
    %c0_i32 = arith.constant 0 : i32
    %c0_i32_0 = arith.constant 0 : i32
    %c0_i32_1 = arith.constant 0 : i32
    return %c0_i32, %c0_i32_0 : i32, i32
  }
  func.func @transform_6(%arg0: i32, %arg1: i32) -> (i32, i32) {
    %c0_i32 = arith.constant 0 : i32
    %c0_i32_0 = arith.constant 0 : i32
    %c0_i32_1 = arith.constant 0 : i32
    return %c0_i32, %c0_i32_0 : i32, i32
  }
  func.func @transform_7(%arg0: i32, %arg1: i32) -> (i32, i32) {
    %c0_i32 = arith.constant 0 : i32
    %c0_i32_0 = arith.constant 0 : i32
    return %arg0, %c0_i32 : i32, i32
  }
}

</mosaic_0001>

<bundles_post_ra>
// kernel: tpu_custom_call.1
= control target key start
LH: loop header
LB: loop body
LE: loop exit
PB: predicated region body
PF: predicated region fallthrough
CT: control target
= control target key end

     0   :  { %vm31_vm0 = vcmask 261120   ;;  %s582_s0 = inlined_call_operand.vmem [shape: f32[16,32], index: 0, kind: input, shape index: {}]   ;;  %s583_s1 = inlined_call_operand.vmem [shape: f32[32,128], index: 1, kind: input, shape index: {}]   ;;  %s584_s2 = inlined_call_operand.vmem [shape: f32[1,128], index: 2, kind: input, shape index: {}]   ;;  %s585_s3 = inlined_call_operand.vmem [shape: f32[64,32], index: 3, kind: input, shape index: {}]   ;;  %s586_s4 = inlined_call_operand.vmem [shape: f32[1,32], index: 4, kind: input, shape index: {}]   ;;  %s587_s5 = inlined_call_operand.vmem [shape: f32[1,32], index: 5, kind: input, shape index: {}]   ;;  %s588_s6 = inlined_call_operand.vmem [shape: f32[1,32], index: 6, kind: input, shape index: {}]   ;;  %s589_s7 = inlined_call_operand.hbm [shape: f32[16,32], index: 7, kind: output, shape index: {}]  }
   0x1   :  { %v36_v0 = vld [vmem:[%s583_s1] sm:$0xff]  ;;  %v37_v1 = vld [vmem:[%s583_s1 + $0x8] sm:$0xff]  ;;  %v38_v2 = vld [vmem:[%s583_s1 + $0x10] sm:$0xff] }
   0x2   :  { %v386_v3 = vpack.c.bf16 %v37_v1, %v36_v0  ;;  %v39_v4 = vld [vmem:[%s583_s1 + $0x18] sm:$0xff]  ;;  %v511_v5 = vld [vmem:[%s582_s0] sm:$0xff] }
   0x3   :  { %v390_v6 = vpack.c.bf16 %v39_v4, %v38_v2  ;;  %364 = vmatprep.mubr.msk.f32.mxu0 %vm31_vm0, %v511_v5 }
   0x4   :  { %12 = vsyncpa [#allocation4], 0  ;;  %387 = vmatprep.subr.bf16.mxu0 %v386_v3  ;;  %v518_v7 = vld [vmem:[%s582_s0 + $0x8] sm:$0xff]  ;;  %v155_v8 = vld [vmem:[%s585_s3] sm:$0xff]  ;;  %v451_v20 = vmov 0.0   ;;  %s452_s29 = smov 64  }
   0x5   :  { %389 = vmatpush3.bf16.msra.mxu0 %v386_v3  ;;  %v156_v9 = vld [vmem:[%s585_s3 + $0x8] sm:$0xff]  ;;  %v157_v10 = vld [vmem:[%s585_s3 + $0x10] sm:$0xff]  ;;  %v158_v12 = vld [vmem:[%s585_s3 + $0x18] sm:$0xff]  ;;  %33 = vst.msk [vmem:[#allocation2 + $0x8] sm:$0xff] %vm31_vm0, %v451_v20  ;;  %vm163_vm1 = vcmask 523264   ;;  %s453_s10 = smov [#allocation3]  }
   0x6   :  { %391 = vmatprep.subr.bf16.mxu0 %v390_v6  ;;  %v394_v11 = vpack.c.bf16 %v156_v9, %v155_v8  ;;  %v398_v13 = vpack.c.bf16 %v158_v12, %v157_v10  ;;  %v159_v14 = vld [vmem:[%s585_s3 + $0x20] sm:$0xff]  ;;  %v160_v15 = vld [vmem:[%s585_s3 + $0x28] sm:$0xff]  ;;  %v161_v17 = vld [vmem:[%s585_s3 + $0x30] sm:$0xff]  ;;  %32 = vst.msk [vmem:[#allocation2] sm:$0xff] %vm31_vm0, %v451_v20  ;;  %s319_s11 = sshll.u32 %s453_s10, 4  ;;  %s320_s11 = int_to_ptr.vmem [resolvable:$true] %s319_s11 }
   0x7   :  { %v402_v16 = vpack.c.bf16 %v160_v15, %v159_v14  ;;  %v162_v18 = vld [vmem:[%s585_s3 + $0x38] sm:$0xff]  ;;  %v330_v21 = vld [vmem:[%s584_s2] ss:$0 sm:$0xff]  ;;  %s427_s12 = scalar_lea.vmem %s320_s11, 256  ;;  %p432_p1 = scmp.lt.s32.totalorder %s320_s11, %s320_s11 }
   0x8   :  { %395 = vmatprep.subr.bf16.mxu1 %v394_v11  ;;  %v406_v19 = vpack.c.bf16 %v162_v18, %v161_v17  ;;  %v337_v46 = vld [vmem:[%s586_s4] ss:$0 sm:$0xff]  ;;  %p428_p0 = scmp.ne.s32.totalorder %s320_s11, %s427_s12  ;;  %p433_p2 = scmp.lt.s32.totalorder %s427_s12, %s427_s12 }
   0x9   :  { %393 = vmatpush3.bf16.msra.mxu0 %v390_v6  ;;  %397 = vmatpush3.bf16.msra.mxu1 %v394_v11  ;;  %v338_v8 = vld [vmem:[%s587_s5] ss:$0 sm:$0xff] }
   0xa   :  { %399 = vmatprep.subr.bf16.mxu1 %v398_v13  ;;  %v339_v10 = vld [vmem:[%s588_s6] ss:$0 sm:$0xff]  ;;  %p434_p3 = por %p433_p2, %p432_p1 }
   0xc   :  { %365 = vmatmul.mubr.msk.f32.vlgmr.msra.gmra.mrb[0].mxu0 %vm31_vm0, %v518_v7  ;;  %v154_v40 = vld [vmem:[#allocation2 + $0x8] sm:$0xff]  ;;  %p435_p4 = pnand %p434_p3, %p428_p0 }
   0xd   :  { %401 = vmatpush3.bf16.msra.mxu1 %v398_v13  ;;  %v153_v41 = vld [vmem:[#allocation2] sm:$0xff] }
   0xe   :  { %403 = vmatprep.subr.bf16.mxu1 %v402_v16 }
  0x11   :  { %405 = vmatpush3.bf16.msra.mxu1 %v402_v16 }
  0x12   :  { %407 = vmatprep.subr.bf16.mxu1 %v406_v19 }
  0x15   :  { %409 = vmatpush3.bf16.msra.mxu1 %v406_v19 }
  0xdf   :  { %v366_v22 = vpop.f32.mrb[0].mxu0 }
  0xe0   :  { %v120_v23 = vpop.f32.mrb[1].mxu0  ;;  %v126_v25 = vadd.f32 %v366_v22, %v330_v21 }
  0xe1   :  { %v121_v24 = vadd.f32 %v330_v21, %v120_v23 }
  0xe2   :  { %v334_v27 = vmul.f32 -1.442695, %v126_v25 }
  0xe3   :  { %145 = vrot.lane.b32.xlu0 %v121_v24, %s452_s29  ;;  %v333_v26 = vmul.f32 -1.442695, %v121_v24 }
  0xe5   :  { %415 = vpow2.f32 %v333_v26 }
  0xe6   :  { %417 = vpow2.f32 %v334_v27 }
  0xe7   :  { %147 = vrot.lane.b32.xlu0 %v126_v25, %s452_s29 }
  0xef   :  { %v416_v28 = vpop.eup %415 }
  0xf0   :  { %v135_v29 = vadd.f32 1.0, %v416_v28  ;;  %v418_v30 = vpop.eup %417 }
  0xf1   :  { %v136_v31 = vadd.f32 1.0, %v418_v30 }
  0xf2   :  { %419 = vrcp.f32 %v135_v29 }
  0xf3   :  { %421 = vrcp.f32 %v136_v31 }
  0xfc   :  { %v420_v32 = vpop.eup %419 }
  0xfd   :  { %v141_v33 = vmul.f32 %v420_v32, %v121_v24  ;;  %v422_v34 = vpop.eup %421 }
  0xfe   :  { %v142_v37 = vmul.f32 %v422_v34, %v126_v25 }
 0x155   :  { %v146_v35 = vpop.permute.xlu0 %145 }
 0x156   :  { %v151_v36 = vmul.f32 %v146_v35, %v141_v33 }
 0x158   :  { %383 = vmatprep.mubr.msk.f32.mxu1 %vm163_vm1, %v151_v36 }
 0x159   :  { %v148_v38 = vpop.permute.xlu0 %147 }
 0x15a   :  { %v152_v39 = vmul.f32 %v148_v38, %v142_v37 }
 0x15c   :  { %384 = vmatmul.mubr.msk.f32.vlgmr.msra.gmra.mrb[0].mxu1 %vm163_vm1, %v152_v39 }
 0x22f   :  { %v385_v42 = vpop.f32.mrb[0].mxu1 }
 0x230   :  { %v246_v43 = vadd.f32 %v385_v42, %v154_v40  ;;  %v236_v44 = vpop.f32.mrb[1].mxu1 }
 0x231   :  { %v245_v45 = vadd.f32 %v236_v44, %v153_v41 }
 0x232   :  { %248 = vst.msk [vmem:[#allocation2 + $0x8] sm:$0xff] %vm31_vm0, %v246_v43 }
 0x233   :  { %247 = vst.msk [vmem:[#allocation2] sm:$0xff] %vm31_vm0, %v245_v45 }
 0x239   :  { %v253_v47 = vld [vmem:[#allocation2 + $0x8] sm:$0xff] }
 0x23a   :  { %v252_v48 = vld [vmem:[#allocation2] sm:$0xff]  ;;  %v262_v50 = vadd.f32 %v337_v46, %v253_v47 }
 0x23b   :  { %v261_v49 = vadd.f32 %v337_v46, %v252_v48 }
 0x23c   :  { %v266_v53 = vadd.f32 %v262_v50, %v518_v7 }
 0x23d   :  { %v265_v51 = vadd.f32 %v261_v49, %v511_v5 }
 0x23e   :  { %v270_v54 = vsel %vm31_vm0, %v266_v53, 0.0 }
 0x23f   :  { %v267_v52 = vsel %vm31_vm0, %v265_v51, 0.0 }
 0x240   :  { %268 = vadd.xlane.f32.xlu1 %v267_v52 }
 0x244   :  { %271 = vadd.xlane.f32.xlu1 %v270_v54 }
 0x2cd   :  { %v269_v55 = vpop.xlane.xlu1 %268 }
 0x2ce   :  { %v274_v56 = vmul.f32 0.03125, %v269_v55 }
 0x2d0   :  { %v276_v57 = vsub.f32 %v265_v51, %v274_v56 }
 0x2d1   :  { %v272_v58 = vpop.xlane.xlu1 %271 }
 0x2d2   :  { %v275_v59 = vmul.f32 0.03125, %v272_v58  ;;  %v278_v60 = vmul.f32 %v276_v57, %v276_v57 }
 0x2d4   :  { %v277_v61 = vsub.f32 %v266_v53, %v275_v59  ;;  %v280_v62 = vsel %vm31_vm0, %v278_v60, 0.0 }
 0x2d5   :  { %281 = vadd.xlane.f32.xlu0 %v280_v62 }
 0x2d6   :  { %v279_v63 = vmul.f32 %v277_v61, %v277_v61 }
 0x2d8   :  { %v283_v0 = vsel %vm31_vm0, %v279_v63, 0.0 }
 0x2d9   :  { %284 = vadd.xlane.f32.xlu1 %v283_v0 }
 0x362   :  { %v282_v1 = vpop.xlane.xlu0 %281 }
 0x363   :  { %v286_v2 = vmul.f32 0.03125, %v282_v1 }
 0x365   :  { %v288_v3 = vadd.f32 1e-12, %v286_v2 }
 0x366   :  { %v285_v4 = vpop.xlane.xlu1 %284 }
 0x367   :  { %423 = vrsqrt.f32 %v288_v3  ;;  %v287_v5 = vmul.f32 0.03125, %v285_v4 }
 0x369   :  { %v289_v6 = vadd.f32 1e-12, %v287_v5 }
 0x36b   :  { %425 = vrsqrt.f32 %v289_v6 }
 0x371   :  { %v424_v7 = vpop.eup %423 }
 0x372   :  { %v292_v9 = vmul.f32 %v424_v7, %v276_v57 }
 0x374   :  { %v301_v11 = vmul.f32 %v338_v8, %v292_v9 }
 0x375   :  { %v426_v12 = vpop.eup %425 }
 0x376   :  { %v293_v13 = vmul.f32 %v426_v12, %v277_v61  ;;  %v310_v14 = vadd.f32 %v339_v10, %v301_v11 }
 0x378   :  { %v302_v15 = vmul.f32 %v338_v8, %v293_v13  ;;  %312 = vst.msk [vmem:[#allocation3] sm:$0xff] %vm31_vm0, %v310_v14 }
 0x37a   :  { %v311_v16 = vadd.f32 %v339_v10, %v302_v15 }
 0x37c   :  { %313 = vst.msk [vmem:[#allocation3 + $0x8] sm:$0xff] %vm31_vm0, %v311_v16 }
 0x37d   :  { %438 = shalt.err (!%p435_p4)
}
 0x37e   :  { %s439_s1 = scalar_lea.hbm %s589_s7, 256 }
 0x37f   :  { %p440_p5 = scmp.ne.s32.totalorder %s589_s7, %s439_s1  ;;  %p443_p6 = scmp.lt.u32.totalorder %s439_s1, %s589_s7 }
 0x381   :  { %p445_p7 = pnand %p443_p6, %p440_p5 }
 0x383   :  { %448 = shalt.err (!%p445_p7)
}
 0x384   :  { %s454_s17 = smov 128   ;;  %s455_s18 = smov 8  }
 0x385   :  { %325 = dma.vmem_to_hbm [thread:$0]  %s320_s11, 256, %s589_s7, [#allocation4], %s454_s17, %s454_s17, %s455_s18  }
 0x386   :  { %449 = dma.done.wait [#allocation4], 256  }
 0x387   :  { %450 = vsyncadd [#allocation4], 4294967040 }
 0x388   :  { %329 = vsyncpa [#allocation4], 1 }

</bundles_post_ra>
